<compile_context>
chip_gen: v5e
topology: v5e:2x2
jax: 0.10.0
libtpu: 0.0.40
codegen_flags: <defaults>
</compile_context>

<pallas_src>
import functools

import jax
import jax.numpy as jnp
from jax import lax
from jax.experimental import pallas as pl
from jax.experimental.pallas import tpu as pltpu


def _loss_kernel(pred_ref, target_ref, out_ref, acc_sq, acc_abs, *,
                 n_elem, steps_per_slice, tile_rows, lanes, rows_total,
                 needs_mask):
    s = pl.program_id(0)          # slice axis ("parallel": megacore on v7x)
    k = pl.program_id(1)          # streaming / reduction axis ("arbitrary")

    @pl.when(k == 0)
    def _init():
        acc_sq[...] = jnp.zeros_like(acc_sq)
        acc_abs[...] = jnp.zeros_like(acc_abs)

    # Upcast on the loaded tile (keeps HBM traffic at the source dtype width).
    d = pred_ref[...].astype(jnp.float32) - target_ref[...].astype(jnp.float32)

    if needs_mask:
        # Zero out rows that fall past the real data (partial trailing tile or
        # clamped out-of-range logical blocks).  Pure VPU select, no XLU.
        row0 = (s * steps_per_slice + k) * tile_rows
        row_ids = row0 + lax.broadcasted_iota(jnp.int32, (tile_rows, lanes), 0)
        d = jnp.where(row_ids < rows_total, d, 0.0)

    # Elementwise accumulation only (no per-step reduction on the hot path).
    acc_sq[...] += d * d
    acc_abs[...] += jnp.abs(d)

    @pl.when(k == pl.num_programs(1) - 1)
    def _finalize():
        inv_n = jnp.float32(1.0 / n_elem)
        partial = (jnp.sum(acc_sq[...]) * inv_n
                   + jnp.sum(acc_abs[...]) * (jnp.float32(0.1) * inv_n))
        # Write a lane-dense (1, 8, 128) block; the wrapper reads [s, 0, 0].
        out_ref[...] = jnp.zeros_like(out_ref) + partial


def _round_up(x, m):
    return (x + m - 1) // m * m


def compatible_enhanced_loss(pred, target, *, tile_rows=2048, lanes=128,
                             num_slices=2):
    """loss = mean((pred-target)**2) + 0.1 * mean(|pred-target|)."""
    assert pred.shape == target.shape, "pred/target must have the same shape"
    n = int(pred.size)
    assert n > 0, "empty input"

    p = pred.reshape(-1)
    t = target.reshape(-1)
    if t.dtype != p.dtype:                      # rare; match PyTorch promotion
        t = t.astype(p.dtype)

    # Minimum sublane tile for the source dtype (f32: 8, bf16/f16: 16, 8-bit: 32).
    itemsize = jnp.dtype(p.dtype).itemsize
    sub_min = {4: 8, 2: 16, 1: 32}.get(itemsize, 8)

    # Only pad the tail so the flat buffer reshapes to (rows, lanes) with a
    # legal sublane count.  This pads < lanes*sub_min elements and is skipped
    # entirely for 128*sub_min-aligned sizes (the common case), avoiding the
    # full-array HBM copy the old wrapper-level pad caused.
    padded_n = _round_up(n, lanes * sub_min)
    if padded_n != n:
        p = jnp.pad(p, (0, padded_n - n))       # zeros contribute 0 to both sums
        t = jnp.pad(t, (0, padded_n - n))

    rows = padded_n // lanes
    p2 = p.reshape(rows, lanes)
    t2 = t.reshape(rows, lanes)

    # Effective tile: big streaming tile, clamped for tiny inputs.  `rows` and
    # the 2048 default are both multiples of sub_min, so the clamp stays legal.
    tile_rows = min(tile_rows, rows)

    total_blocks = pl.cdiv(rows, tile_rows)
    num_slices = max(1, min(num_slices, total_blocks))
    steps_per_slice = pl.cdiv(total_blocks, num_slices)

    # Masking is only needed when some tile is partial or some slice covers
    # logical blocks past the end (those get clamped to the last real block).
    needs_mask = (rows % tile_rows != 0) or (total_blocks % num_slices != 0)

    kernel = functools.partial(
        _loss_kernel,
        n_elem=float(n),
        steps_per_slice=steps_per_slice,
        tile_rows=tile_rows,
        lanes=lanes,
        rows_total=rows,
        needs_mask=needs_mask,
    )

    def in_map(s, k):
        # Clamp so the DMA never indexes past the last real block; clamped
        # duplicates are fully masked out inside the kernel.
        return (jnp.minimum(s * steps_per_slice + k, total_blocks - 1), 0)

    out = pl.pallas_call(
        kernel,
        out_shape=jax.ShapeDtypeStruct((num_slices, 8, 128), jnp.float32),
        grid_spec=pltpu.PrefetchScalarGridSpec(
            num_scalar_prefetch=0,
            grid=(num_slices, steps_per_slice),
            in_specs=[
                pl.BlockSpec((tile_rows, lanes), in_map),
                pl.BlockSpec((tile_rows, lanes), in_map),
            ],
            out_specs=pl.BlockSpec((1, 8, 128), lambda s, k: (s, 0, 0)),
            scratch_shapes=[
                pltpu.VMEM((tile_rows, lanes), jnp.float32),   # sum of d^2
                pltpu.VMEM((tile_rows, lanes), jnp.float32),   # sum of |d|
            ],
        ),
        compiler_params=pltpu.CompilerParams(
            dimension_semantics=("parallel", "arbitrary"),
        ),
    )(p2, t2)

    # Per-slice partial losses are linear in the sums, so they just add up.
    return jnp.sum(out[:, 0, 0])


if __name__ == "__main__":
    key = jax.random.PRNGKey(0)
    k1, k2, k3, k4, k5, k6 = jax.random.split(key, 6)

    def ref_loss(pred, target):
        d = pred.astype(jnp.float32) - target.astype(jnp.float32)
        return jnp.mean(d * d) + 0.1 * jnp.mean(jnp.abs(d))

    # Case 1: small f32 input, default (single-slice) configuration.
    pred = jax.random.normal(k1, (2, 4, 16, 16), dtype=jnp.float32)
    target = jax.random.normal(k2, (2, 4, 16, 16), dtype=jnp.float32)
    loss = jax.block_until_ready(compatible_enhanced_loss(pred, target))
    ref = ref_loss(pred, target)
    assert jnp.allclose(loss, ref, rtol=1e-5, atol=1e-6), (loss, ref)

    # Case 2: multi-slice grid with clamped tail blocks (exercises the
    # "parallel" slice axis used for v7x megacore and the in-kernel masking).
    pred2 = jax.random.normal(k3, (2, 4, 16, 32), dtype=jnp.float32)
    target2 = jax.random.normal(k4, (2, 4, 16, 32), dtype=jnp.float32)
    loss2 = jax.block_until_ready(
        compatible_enhanced_loss(pred2, target2, tile_rows=8, num_slices=3))
    ref2 = ref_loss(pred2, target2)
    assert jnp.allclose(loss2, ref2, rtol=1e-5, atol=1e-6), (loss2, ref2)

    # Case 3: bf16 inputs stay bf16 in HBM; the f32 upcast happens in-kernel.
    pred3 = jax.random.normal(k5, (2, 4, 16, 16), dtype=jnp.bfloat16)
    target3 = jax.random.normal(k6, (2, 4, 16, 16), dtype=jnp.bfloat16)
    loss3 = jax.block_until_ready(compatible_enhanced_loss(pred3, target3))
    ref3 = ref_loss(pred3, target3)
    assert jnp.allclose(loss3, ref3, rtol=1e-5, atol=1e-6), (loss3, ref3)

    print("KERNEL_OK")
</pallas_src>

<mosaic_0001>
module attributes {stable_mosaic.version = 11 : i64} {
  func.func @_loss_kernel(%arg0: i32, %arg1: i32, %arg2: memref<16x128xf32, #tpu.memory_space<vmem>>, %arg3: memref<16x128xf32, #tpu.memory_space<vmem>>, %arg4: memref<1x8x128xf32, #tpu.memory_space<vmem>>, %arg5: memref<16x128xf32, #tpu.memory_space<vmem>>, %arg6: memref<16x128xf32, #tpu.memory_space<vmem>>) attributes {dimension_semantics = [#tpu.dimension_semantics<parallel>, #tpu.dimension_semantics<arbitrary>], iteration_bounds = array<i64: 1, 1>, scalar_prefetch = 0 : i64, scratch_operands = 2 : i64, tpu.core_type = #tpu.core_type<tc>, window_params = [{transform_indices = @transform_0, window_bounds = array<i64: 16, 128>}, {transform_indices = @transform_1, window_bounds = array<i64: 16, 128>}, {transform_indices = @transform_2, window_bounds = array<i64: 1, 8, 128>}]} {
    %c0_i32 = arith.constant 0 : i32
    %0 = arith.cmpi eq, %arg1, %c0_i32 : i32
    %1 = arith.extui %0 : i1 to i32
    %c0_i32_0 = arith.constant 0 : i32
    %2 = arith.cmpi ne, %1, %c0_i32_0 : i32
    scf.if %2 {
      %cst = arith.constant 0.000000e+00 : f32
      %17 = vector.broadcast %cst : f32 to vector<16x128xf32>
      %c0_14 = arith.constant 0 : index
      %c0_15 = arith.constant 0 : index
      %18 = vector.load %arg5[%c0_14, %c0_15] : memref<16x128xf32, #tpu.memory_space<vmem>>, vector<16x128xf32>
      tpu.vector_store %arg5[%c0_14, %c0_15], %17 {strides = array<i32>} : memref<16x128xf32, #tpu.memory_space<vmem>>, vector<16x128xf32>,
      %cst_16 = arith.constant 0.000000e+00 : f32
      %19 = vector.broadcast %cst_16 : f32 to vector<16x128xf32>
      %c0_17 = arith.constant 0 : index
      %c0_18 = arith.constant 0 : index
      %20 = vector.load %arg6[%c0_17, %c0_18] : memref<16x128xf32, #tpu.memory_space<vmem>>, vector<16x128xf32>
      tpu.vector_store %arg6[%c0_17, %c0_18], %19 {strides = array<i32>} : memref<16x128xf32, #tpu.memory_space<vmem>>, vector<16x128xf32>,
    } else {
    }
    %c0 = arith.constant 0 : index
    %c0_1 = arith.constant 0 : index
    %3 = vector.load %arg2[%c0, %c0_1] : memref<16x128xf32, #tpu.memory_space<vmem>>, vector<16x128xf32>
    %c0_2 = arith.constant 0 : index
    %c0_3 = arith.constant 0 : index
    %4 = vector.load %arg3[%c0_2, %c0_3] : memref<16x128xf32, #tpu.memory_space<vmem>>, vector<16x128xf32>
    %5 = arith.subf %3, %4 : vector<16x128xf32>
    %c0_4 = arith.constant 0 : index
    %c0_5 = arith.constant 0 : index
    %6 = vector.load %arg5[%c0_4, %c0_5] : memref<16x128xf32, #tpu.memory_space<vmem>>, vector<16x128xf32>
    %7 = arith.mulf %5, %5 : vector<16x128xf32>
    %8 = arith.addf %6, %7 : vector<16x128xf32>
    %c0_6 = arith.constant 0 : index
    %c0_7 = arith.constant 0 : index
    %9 = vector.load %arg5[%c0_6, %c0_7] : memref<16x128xf32, #tpu.memory_space<vmem>>, vector<16x128xf32>
    tpu.vector_store %arg5[%c0_6, %c0_7], %8 {strides = array<i32>} : memref<16x128xf32, #tpu.memory_space<vmem>>, vector<16x128xf32>,
    %c0_8 = arith.constant 0 : index
    %c0_9 = arith.constant 0 : index
    %10 = vector.load %arg6[%c0_8, %c0_9] : memref<16x128xf32, #tpu.memory_space<vmem>>, vector<16x128xf32>
    %11 = math.absf %5 : vector<16x128xf32>
    %12 = arith.addf %10, %11 : vector<16x128xf32>
    %c0_10 = arith.constant 0 : index
    %c0_11 = arith.constant 0 : index
    %13 = vector.load %arg6[%c0_10, %c0_11] : memref<16x128xf32, #tpu.memory_space<vmem>>, vector<16x128xf32>
    tpu.vector_store %arg6[%c0_10, %c0_11], %12 {strides = array<i32>} : memref<16x128xf32, #tpu.memory_space<vmem>>, vector<16x128xf32>,
    %c0_i32_12 = arith.constant 0 : i32
    %14 = arith.cmpi eq, %arg1, %c0_i32_12 : i32
    %15 = arith.extui %14 : i1 to i32
    %c0_i32_13 = arith.constant 0 : i32
    %16 = arith.cmpi ne, %15, %c0_i32_13 : i32
    scf.if %16 {
      %c0_14 = arith.constant 0 : index
      %c0_15 = arith.constant 0 : index
      %17 = vector.load %arg5[%c0_14, %c0_15] : memref<16x128xf32, #tpu.memory_space<vmem>>, vector<16x128xf32>
      %18 = vector.shape_cast %17 : vector<16x128xf32> to vector<1x16x128xf32>
      %cst = arith.constant dense<0.000000e+00> : vector<1xf32>
      %19 = vector.multi_reduction <add>, %18, %cst [1, 2] : vector<1x16x128xf32> to vector<1xf32>
      %20 = vector.shape_cast %19 : vector<1xf32> to vector<1x1x1xf32>
      %21 = vector.extract %20[0, 0, 0] : f32 from vector<1x1x1xf32>
      %cst_16 = arith.constant 4.8828125E-4 : f32
      %22 = arith.mulf %21, %cst_16 : f32
      %c0_17 = arith.constant 0 : index
      %c0_18 = arith.constant 0 : index
      %23 = vector.load %arg6[%c0_17, %c0_18] : memref<16x128xf32, #tpu.memory_space<vmem>>, vector<16x128xf32>
      %24 = vector.shape_cast %23 : vector<16x128xf32> to vector<1x16x128xf32>
      %cst_19 = arith.constant dense<0.000000e+00> : vector<1xf32>
      %25 = vector.multi_reduction <add>, %24, %cst_19 [1, 2] : vector<1x16x128xf32> to vector<1xf32>
      %26 = vector.shape_cast %25 : vector<1xf32> to vector<1x1x1xf32>
      %27 = vector.extract %26[0, 0, 0] : f32 from vector<1x1x1xf32>
      %cst_20 = arith.constant 1.000000e-01 : f32
      %cst_21 = arith.constant 4.8828125E-4 : f32
      %28 = arith.mulf %cst_20, %cst_21 : f32
      %29 = arith.mulf %27, %28 : f32
      %30 = arith.addf %22, %29 : f32
      %cst_22 = arith.constant 0.000000e+00 : f32
      %31 = vector.broadcast %cst_22 : f32 to vector<1x8x128xf32>
      %32 = vector.broadcast %30 : f32 to vector<1x8x128xf32>
      %33 = arith.addf %31, %32 : vector<1x8x128xf32>
      %c0_23 = arith.constant 0 : index
      %c0_24 = arith.constant 0 : index
      %c0_25 = arith.constant 0 : index
      %34 = vector.load %arg4[%c0_23, %c0_24, %c0_25] : memref<1x8x128xf32, #tpu.memory_space<vmem>>, vector<1x8x128xf32>
      tpu.vector_store %arg4[%c0_23, %c0_24, %c0_25], %33 {strides = array<i32>} : memref<1x8x128xf32, #tpu.memory_space<vmem>>, vector<1x8x128xf32>,
    } else {
    }
    return
  }
  func.func @transform_0(%arg0: i32, %arg1: i32) -> (i32, i32) {
    %c1_i32 = arith.constant 1 : i32
    %0 = arith.muli %arg0, %c1_i32 : i32
    %1 = arith.addi %0, %arg1 : i32
    %c0_i32 = arith.constant 0 : i32
    %2 = arith.minsi %1, %c0_i32 : i32
    %c0_i32_0 = arith.constant 0 : i32
    %c0_i32_1 = arith.constant 0 : i32
    return %2, %c0_i32_0 : i32, i32
  }
  func.func @transform_1(%arg0: i32, %arg1: i32) -> (i32, i32) {
    %c1_i32 = arith.constant 1 : i32
    %0 = arith.muli %arg0, %c1_i32 : i32
    %1 = arith.addi %0, %arg1 : i32
    %c0_i32 = arith.constant 0 : i32
    %2 = arith.minsi %1, %c0_i32 : i32
    %c0_i32_0 = arith.constant 0 : i32
    %c0_i32_1 = arith.constant 0 : i32
    return %2, %c0_i32_0 : i32, i32
  }
  func.func @transform_2(%arg0: i32, %arg1: i32) -> (i32, i32, i32) {
    %c0_i32 = arith.constant 0 : i32
    %c0_i32_0 = arith.constant 0 : i32
    %c0_i32_1 = arith.constant 0 : i32
    return %arg0, %c0_i32, %c0_i32_0 : i32, i32, i32
  }
}

</mosaic_0001>

<bundles_post_ra>
// kernel: tpu_custom_call.1
= control target key start
LH: loop header
LB: loop body
LE: loop exit
PB: predicated region body
PF: predicated region fallthrough
CT: control target
= control target key end

     0   :  { %7 = vsyncpa [#allocation5], 0  ;;  %s265_s0 = inlined_call_operand.hbm [shape: f32[16,128], index: 0, kind: input, shape index: {}]   ;;  %s266_s1 = inlined_call_operand.hbm [shape: f32[16,128], index: 1, kind: input, shape index: {}]   ;;  %s267_s2 = inlined_call_operand.hbm [shape: f32[1,8,128], index: 2, kind: output, shape index: {}]  }
   0x1   :  { %8 = vsyncpa [#allocation8], 0 }
   0x2   :  { %9 = vsyncpa [#allocation6], 0  ;;  %s20_s11 = sshll.u32 %s265_s0, 4  ;;  %s236_s12 = smov [#allocation4]   ;;  %s21_s11 = int_to_ptr.hbm [resolvable:$true] %s20_s11 }
   0x3   :  { %s22_s13 = sshll.u32 %s236_s12, 4  ;;  %s39_s16 = sshll.u32 %s266_s1, 4  ;;  %s23_s13 = int_to_ptr.vmem [resolvable:$true] %s22_s13  ;;  %s40_s16 = int_to_ptr.hbm [resolvable:$true] %s39_s16 }
   0x4   :  { %s237_s17 = smov 128   ;;  %s238_s18 = smov 8  }
   0x5   :  { %28 = dma.hbm_to_vmem [thread:$0]  %s21_s11, 256, %s23_s13, [#allocation5], %s237_s17, %s237_s17, %s238_s18  }
   0x6   :  { %s239_s19 = smov [#allocation7]  }
   0x7   :  { %s41_s20 = sshll.u32 %s239_s19, 4  ;;  %s42_s20 = int_to_ptr.vmem [resolvable:$true] %s41_s20 }
   0x8   :  { %47 = dma.hbm_to_vmem [thread:$0]  %s40_s16, 256, %s42_s20, [#allocation8], %s237_s17, %s237_s17, %s238_s18  }
   0x9   :  { %230 = dma.done.wait [#allocation5], 256  }
   0xa   :  { %231 = vsyncadd [#allocation5], 4294967040 }
   0xb   :  { %232 = dma.done.wait [#allocation8], 256  }
   0xc   :  { %233 = vsyncadd [#allocation8], 4294967040  ;;  %v72_v0 = vld [vmem:[#allocation4] sm:$0xff]  ;;  %v73_v1 = vld [vmem:[#allocation4 + $0x8] sm:$0xff]  ;;  %s240_s1 = smov [#allocation9]   ;;  %s134_s27 = sshll.u32 %s267_s2, 4  ;;  %s135_s27 = int_to_ptr.hbm [resolvable:$true] %s134_s27 }
   0xd   :  { %v74_v2 = vld [vmem:[#allocation7] sm:$0xff]  ;;  %v75_v3 = vld [vmem:[#allocation7 + $0x8] sm:$0xff]  ;;  %s132_s21 = sshll.u32 %s240_s1, 4  ;;  %s133_s21 = int_to_ptr.vmem [resolvable:$true] %s132_s21 }
   0xe   :  { %v76_v4 = vsub.f32 %v72_v0, %v74_v2  ;;  %v77_v5 = vsub.f32 %v73_v1, %v75_v3 }
  0x10   :  { %v80_v6 = vmul.f32 %v76_v4, %v76_v4  ;;  %v81_v7 = vmul.f32 %v77_v5, %v77_v5  ;;  %v88_v9 = vand.u32 2147483647, %v76_v4  ;;  %v89_v10 = vand.u32 2147483647, %v77_v5 }
  0x12   :  { %v99_v8 = vadd.f32 %v81_v7, %v80_v6  ;;  %v112_v11 = vadd.f32 %v89_v10, %v88_v9 }
  0x14   :  { %100 = vadd.xlane.f32.xlu0 %v99_v8 }
  0x1c   :  { %113 = vadd.xlane.f32.xlu0 %v112_v11 }
  0x87   :  { %v101_v12 = vpop.xlane.xlu0 %100 }
  0x88   :  { %v102_v13 = vrot.slane %v101_v12, 4 }
  0x8a   :  { %v103_v14 = vadd.f32 %v102_v13, %v101_v12 }
  0x8c   :  { %v104_v15 = vrot.slane %v103_v14, 2 }
  0x8e   :  { %v105_v16 = vadd.f32 %v104_v15, %v103_v14 }
  0x8f   :  { %v114_v17 = vpop.xlane.xlu0 %113 }
  0x90   :  { %v115_v18 = vrot.slane %v114_v17, 4  ;;  %v106_v19 = vrot.slane %v105_v16, 1 }
  0x92   :  { %v116_v20 = vadd.f32 %v115_v18, %v114_v17  ;;  %v107_v21 = vadd.f32 %v106_v19, %v105_v16 }
  0x94   :  { %v117_v22 = vrot.slane %v116_v20, 2  ;;  %149 = vpush %v107_v21 }
  0x96   :  { %v118_v23 = vadd.f32 %v117_v22, %v116_v20 }
  0x98   :  { %v119_v24 = vrot.slane %v118_v23, 1 }
  0x9a   :  { %v120_v25 = vadd.f32 %v119_v24, %v118_v23 }
  0x9c   :  { %151 = vpush %v120_v25 }
  0xc5   :  { %s150_s0 = spop %149 }
  0xc6   :  { %s109_s22 = smul.f32 0.00048828125, %s150_s0 }
  0xcd   :  { %s152_s23 = spop %151 }
  0xce   :  { %s122_s24 = smul.f32 4.8828126e-05, %s152_s23 }
  0xd0   :  { %s123_s28 = sadd.f32 %s122_s24, %s109_s22 }
  0xd2   :  { %v124_v26 = vstv %s123_s28 }
  0xd3   :  { %126 = vst [vmem:[#allocation9] sm:$0xff] %v124_v26 }
  0xd4   :  { %137 = dma.vmem_to_hbm [thread:$0]  %s133_s21, 128, %s135_s27, [#allocation6]  }
  0xd5   :  { %234 = dma.done.wait [#allocation6], 128  }
  0xd6   :  { %235 = vsyncadd [#allocation6], 4294967168 }
  0xd7   :  { %142 = vsyncpa [#allocation5], 1 }
  0xd8   :  { %143 = vsyncpa [#allocation8], 1 }
  0xd9   :  { %144 = vsyncpa [#allocation6], 1 }

</bundles_post_ra>
